<compile_context>
chip_gen: v6e
topology: v6e:2x2x1
jax: 0.10.0
libtpu: 0.0.40
codegen_flags: <defaults>
</compile_context>

<pallas_src>
import jax
import jax.numpy as jnp
from jax.experimental import pallas as pl
from jax.experimental.pallas import tpu as pltpu


def _round_up(x, m):
    return ((x + m - 1) // m) * m


def _visual_emb_kernel(x_ref, w_ref, b_ref, o_ref):
    # x_ref : (TM, F)  tile of flattened visual features (double-buffered)
    # w_ref : (F, E)   weight, MXU-native orientation (resident)
    # b_ref : (1, E)   bias, f32 (resident)
    # o_ref : (TM, E)
    acc = jnp.dot(x_ref[...], w_ref[...], preferred_element_type=jnp.float32)
    o_ref[...] = (acc + b_ref[...]).astype(o_ref.dtype)


def _vmem_budget_bytes():
    # ~0.75 x physical VMEM: ~96 MiB on v5e/v6e (128 MiB), ~48 MiB on v7x (64 MiB).
    try:
        cap = int(pltpu.get_tpu_info().vmem_capacity_bytes)
    except Exception:
        cap = 64 * 1024 * 1024  # conservative fallback (v7x-sized)
    return (3 * cap) // 4


def visual_encoder_forward(inp, weight, bias, *, tm=1024, compute_dtype=None):
    """Pallas equivalent of VisualEncoder.forward.

    inp    : (B, S, feat_size)
    weight : (embed_dim, feat_size)   -- PyTorch nn.Linear convention
    bias   : (embed_dim,)
    returns: (B, S, embed_dim)
    """
    B, S, F = inp.shape
    E = weight.shape[0]
    M = B * S
    out_dtype = inp.dtype

    x2d = inp.reshape(M, F)
    # One-time transpose of a parameter (hoisted/const-folded by XLA); gives
    # the kernel an MXU-native RHS so nothing is re-transposed per grid step.
    w_fe = weight.T                                   # (F, E)
    b2d = bias.reshape(1, E).astype(jnp.float32)

    if compute_dtype is not None:                     # optional bandwidth lever
        x2d = x2d.astype(compute_dtype)
        w_fe = w_fe.astype(compute_dtype)

    # Lane-density padding (no-op at the demo shape, exact numerics: zero
    # K-padding and sliced-off extra output columns).
    Fp = _round_up(F, 128) if (F >= 128 and F % 128) else F
    Ep = _round_up(E, 128) if (E >= 128 and E % 128) else E
    if Fp != F:
        x2d = jnp.pad(x2d, ((0, 0), (0, Fp - F)))
        w_fe = jnp.pad(w_fe, ((0, Fp - F), (0, 0)))
    if Ep != E:
        w_fe = jnp.pad(w_fe, ((0, 0), (0, Ep - E)))
        b2d = jnp.pad(b2d, ((0, 0), (0, Ep - E)))

    itemsize_x = jnp.dtype(x2d.dtype).itemsize
    itemsize_w = jnp.dtype(w_fe.dtype).itemsize
    itemsize_o = jnp.dtype(out_dtype).itemsize

    def needed(tm_rows):
        return (2 * tm_rows * Fp * itemsize_x      # x tile, double-buffered
                + 2 * tm_rows * Ep * itemsize_o    # out tile, double-buffered
                + 2 * Fp * Ep * itemsize_w         # weight (2 bufs: covers fallback)
                + 2 * Ep * 4)                      # bias (f32)

    budget = _vmem_budget_bytes()

    # Row tile: large (amortizes per-grid-step pipeline overhead, esp. v7x),
    # multiple of 8, capped so that (a) it fits the VMEM budget and (b) the
    # grid has >= 2 steps when M >= 16 so both v7x TensorCores get work.
    TM = min(tm, _round_up(M, 8))
    if M >= 16:
        TM = min(TM, _round_up(pl.cdiv(M, 2), 8))
    while TM > 8 and needed(TM) > budget:
        TM = max(8, _round_up(TM // 2, 8))

    grid = (pl.cdiv(M, TM),)
    vmem_limit = int(min(budget, max(2 * needed(TM), 4 * 1024 * 1024)))

    x_spec = pl.BlockSpec((TM, Fp), lambda i: (i, 0))      # tiled over M
    out_spec = pl.BlockSpec((TM, Ep), lambda i: (i, 0))

    def run(single_buffer_params):
        if single_buffer_params:
            w_spec = pl.BlockSpec((Fp, Ep), lambda i: (0, 0),
                                  pipeline_mode=pl.Buffered(1))
            b_spec = pl.BlockSpec((1, Ep), lambda i: (0, 0),
                                  pipeline_mode=pl.Buffered(1))
        else:
            w_spec = pl.BlockSpec((Fp, Ep), lambda i: (0, 0))
            b_spec = pl.BlockSpec((1, Ep), lambda i: (0, 0))
        return pl.pallas_call(
            _visual_emb_kernel,
            out_shape=jax.ShapeDtypeStruct((M, Ep), out_dtype),
            grid=grid,
            in_specs=[x_spec, w_spec, b_spec],
            out_specs=out_spec,
            compiler_params=pltpu.CompilerParams(
                dimension_semantics=("parallel",),          # no reduction axis
                vmem_limit_bytes=vmem_limit,
            ),
        )(x2d, w_fe, b2d)

    try:
        out2d = run(True)
    except Exception:
        # Fallback for JAX builds that reject pipeline_mode=pl.Buffered(1) on
        # a pallas_call BlockSpec; the VMEM budget already covers the extra
        # (double) parameter buffers in that case.
        out2d = run(False)

    if Ep != E:
        out2d = out2d[:, :E]
    return out2d.reshape(B, S, E)


def reference_forward(inp, weight, bias):
    B, S, F = inp.shape
    x2d = inp.reshape(B * S, F)
    out = x2d @ weight.T + bias
    return out.reshape(B, S, -1)


if __name__ == "__main__":
    # Small deterministic shapes consistent with the module:
    #   batch=2, story_size=5, feat_size=64, word_embed_dim=32
    B, S, FEAT, EMBED = 2, 5, 64, 32

    key = jax.random.PRNGKey(0)
    k_in, k_w, k_b = jax.random.split(key, 3)

    inp = jax.random.normal(k_in, (B, S, FEAT), dtype=jnp.float32)
    # Deterministic parameter init (mimic nn.Linear uniform(-1/sqrt(F), 1/sqrt(F)))
    bound = 1.0 / (FEAT ** 0.5)
    weight = jax.random.uniform(k_w, (EMBED, FEAT), jnp.float32, -bound, bound)
    bias = jax.random.uniform(k_b, (EMBED,), jnp.float32, -bound, bound)

    out = visual_encoder_forward(inp, weight, bias)
    out = jax.block_until_ready(out)

    ref = reference_forward(inp, weight, bias)
    assert out.shape == (B, S, EMBED)
    assert jnp.allclose(out, ref, atol=1e-5, rtol=1e-5), "mismatch vs reference"

    print("KERNEL_OK")
</pallas_src>

<mosaic_0001>
module attributes {stable_mosaic.version = 11 : i64} {
  func.func @_visual_emb_kernel(%arg0: i32, %arg1: memref<16x64xf32, #tpu.memory_space<vmem>>, %arg2: memref<64x32xf32, #tpu.memory_space<vmem>>, %arg3: memref<1x32xf32, #tpu.memory_space<vmem>>, %arg4: memref<16x32xf32, #tpu.memory_space<vmem>>) attributes {dimension_semantics = [#tpu.dimension_semantics<parallel>], iteration_bounds = array<i64: 1>, scalar_prefetch = 0 : i64, scratch_operands = 0 : i64, tpu.core_type = #tpu.core_type<tc>, window_params = [{transform_indices = @transform_0, window_bounds = array<i64: 16, 64>}, {pipeline_mode = #tpu.pipeline_mode<synchronous>, transform_indices = @transform_1, window_bounds = array<i64: 64, 32>}, {pipeline_mode = #tpu.pipeline_mode<synchronous>, transform_indices = @transform_2, window_bounds = array<i64: 1, 32>}, {transform_indices = @transform_3, window_bounds = array<i64: 16, 32>}]} {
    %c0 = arith.constant 0 : index
    %c0_0 = arith.constant 0 : index
    %0 = vector.load %arg1[%c0, %c0_0] : memref<16x64xf32, #tpu.memory_space<vmem>>, vector<16x64xf32>
    %c0_1 = arith.constant 0 : index
    %c0_2 = arith.constant 0 : index
    %1 = vector.load %arg2[%c0_1, %c0_2] : memref<64x32xf32, #tpu.memory_space<vmem>>, vector<64x32xf32>
    %cst = arith.constant dense<0.000000e+00> : vector<16x32xf32>
    %2 = tpu.matmul %0, %1, %cst {dimension_numbers = #tpu.dot_dimension_numbers<[1], [0], [0], [1], [0, 0, 1, 1], [], []>} : vector<16x64xf32>, vector<64x32xf32>, vector<16x32xf32> -> vector<16x32xf32>
    %c0_3 = arith.constant 0 : index
    %c0_4 = arith.constant 0 : index
    %3 = vector.load %arg3[%c0_3, %c0_4] : memref<1x32xf32, #tpu.memory_space<vmem>>, vector<1x32xf32>
    %4 = vector.broadcast %3 : vector<1x32xf32> to vector<16x32xf32>
    %5 = arith.addf %2, %4 : vector<16x32xf32>
    %c0_5 = arith.constant 0 : index
    %c0_6 = arith.constant 0 : index
    %6 = vector.load %arg4[%c0_5, %c0_6] : memref<16x32xf32, #tpu.memory_space<vmem>>, vector<16x32xf32>
    tpu.vector_store %arg4[%c0_5, %c0_6], %5 {strides = array<i32>} : memref<16x32xf32, #tpu.memory_space<vmem>>, vector<16x32xf32>,
    return
  }
  func.func @transform_0(%arg0: i32) -> (i32, i32) {
    %c0_i32 = arith.constant 0 : i32
    %c0_i32_0 = arith.constant 0 : i32
    return %arg0, %c0_i32 : i32, i32
  }
  func.func @transform_1(%arg0: i32) -> (i32, i32) {
    %c0_i32 = arith.constant 0 : i32
    %c0_i32_0 = arith.constant 0 : i32
    %c0_i32_1 = arith.constant 0 : i32
    return %c0_i32, %c0_i32_0 : i32, i32
  }
  func.func @transform_2(%arg0: i32) -> (i32, i32) {
    %c0_i32 = arith.constant 0 : i32
    %c0_i32_0 = arith.constant 0 : i32
    %c0_i32_1 = arith.constant 0 : i32
    return %c0_i32, %c0_i32_0 : i32, i32
  }
  func.func @transform_3(%arg0: i32) -> (i32, i32) {
    %c0_i32 = arith.constant 0 : i32
    %c0_i32_0 = arith.constant 0 : i32
    return %arg0, %c0_i32 : i32, i32
  }
}

module attributes {stable_mosaic.version = 11 : i64} {
  func.func @_visual_emb_kernel(%arg0: i32, %arg1: memref<16x64xf32, #tpu.memory_space<vmem>>, %arg2: memref<64x32xf32, #tpu.memory_space<vmem>>, %arg3: memref<1x32xf32, #tpu.memory_space<vmem>>, %arg4: memref<16x32xf32, #tpu.memory_space<vmem>>) attributes {dimension_semantics = [#tpu.dimension_semantics<parallel>], iteration_bounds = array<i64: 1>, scalar_prefetch = 0 : i64, scratch_operands = 0 : i64, tpu.core_type = #tpu.core_type<tc>, window_params = [{transform_indices = @transform_0, window_bounds = array<i64: 16, 64>}, {pipeline_mode = #tpu.pipeline_mode<synchronous>, transform_indices = @transform_1, window_bounds = array<i64: 64, 32>}, {pipeline_mode = #tpu.pipeline_mode<synchronous>, transform_indices = @transform_2, window_bounds = array<i64: 1, 32>}, {transform_indices = @transform_3, window_bounds = array<i64: 16, 32>}]} {
    %c0 = arith.constant 0 : index
    %c0_0 = arith.constant 0 : index
    %0 = vector.load %arg1[%c0, %c0_0] : memref<16x64xf32, #tpu.memory_space<vmem>>, vector<16x64xf32>
    %c0_1 = arith.constant 0 : index
    %c0_2 = arith.constant 0 : index
    %1 = vector.load %arg2[%c0_1, %c0_2] : memref<64x32xf32, #tpu.memory_space<vmem>>, vector<64x32xf32>
    %cst = arith.constant dense<0.000000e+00> : vector<16x32xf32>
    %2 = tpu.matmul %0, %1, %cst {dimension_numbers = #tpu.dot_dimension_numbers<[1], [0], [0], [1], [0, 0, 1, 1], [], []>} : vector<16x64xf32>, vector<64x32xf32>, vector<16x32xf32> -> vector<16x32xf32>
    %c0_3 = arith.constant 0 : index
    %c0_4 = arith.constant 0 : index
    %3 = vector.load %arg3[%c0_3, %c0_4] : memref<1x32xf32, #tpu.memory_space<vmem>>, vector<1x32xf32>
    %4 = vector.broadcast %3 : vector<1x32xf32> to vector<16x32xf32>
    %5 = arith.addf %2, %4 : vector<16x32xf32>
    %c0_5 = arith.constant 0 : index
    %c0_6 = arith.constant 0 : index
    %6 = vector.load %arg4[%c0_5, %c0_6] : memref<16x32xf32, #tpu.memory_space<vmem>>, vector<16x32xf32>
    tpu.vector_store %arg4[%c0_5, %c0_6], %5 {strides = array<i32>} : memref<16x32xf32, #tpu.memory_space<vmem>>, vector<16x32xf32>,
    return
  }
  func.func @transform_0(%arg0: i32) -> (i32, i32) {
    %c0_i32 = arith.constant 0 : i32
    %c0_i32_0 = arith.constant 0 : i32
    return %arg0, %c0_i32 : i32, i32
  }
  func.func @transform_1(%arg0: i32) -> (i32, i32) {
    %c0_i32 = arith.constant 0 : i32
    %c0_i32_0 = arith.constant 0 : i32
    %c0_i32_1 = arith.constant 0 : i32
    return %c0_i32, %c0_i32_0 : i32, i32
  }
  func.func @transform_2(%arg0: i32) -> (i32, i32) {
    %c0_i32 = arith.constant 0 : i32
    %c0_i32_0 = arith.constant 0 : i32
    %c0_i32_1 = arith.constant 0 : i32
    return %c0_i32, %c0_i32_0 : i32, i32
  }
  func.func @transform_3(%arg0: i32) -> (i32, i32) {
    %c0_i32 = arith.constant 0 : i32
    %c0_i32_0 = arith.constant 0 : i32
    return %arg0, %c0_i32 : i32, i32
  }
}

</mosaic_0001>

<bundles_post_ra>
// kernel: tpu_custom_call.1
= control target key start
LH: loop header
LB: loop body
LE: loop exit
PB: predicated region body
PF: predicated region fallthrough
CT: control target
= control target key end

     0   :  { %vm32_vm0 = vcmask 523264   ;;  %s251_s0 = inlined_call_operand.vmem [shape: f32[10,64], index: 0, kind: input, shape index: {}]   ;;  %s252_s1 = inlined_call_operand.vmem [shape: f32[64,32], index: 1, kind: input, shape index: {}]   ;;  %s253_s2 = inlined_call_operand.vmem [shape: f32[1,32], index: 2, kind: input, shape index: {}]   ;;  %s254_s3 = inlined_call_operand.hbm [shape: f32[10,32], index: 3, kind: output, shape index: {}]  }
   0x1   :  { %v24_v0 = vld [vmem:[%s252_s1 + $0x38] sm:$0xff]  ;;  %v23_v1 = vld [vmem:[%s252_s1 + $0x30] sm:$0xff]  ;;  %v22_v2 = vld [vmem:[%s252_s1 + $0x28] sm:$0xff] }
   0x2   :  { %146 = vmatprep.subr.mxu0 %v24_v0  ;;  %v15_v3 = vld [vmem:[%s251_s0] sm:$0xff] }
   0x3   :  { %147 = vmatpush3.msra.mxu0 %v24_v0  ;;  %162 = vmatprep.mubr.msk.f32.mxu0 %vm32_vm0, %v15_v3 }
   0x4   :  { %148 = vmatprep.subr.mxu0 %v23_v1 }
   0x5   :  { %8 = vsyncpa [#allocation3], 0  ;;  %149 = vmatpush3.msra.mxu0 %v23_v1  ;;  %v21_v4 = vld [vmem:[%s252_s1 + $0x20] sm:$0xff]  ;;  %v20_v5 = vld [vmem:[%s252_s1 + $0x18] sm:$0xff]  ;;  %s190_s7 = smov [#allocation2]   ;;  %vm114_vm1 = vcmask 261120  }
   0x6   :  { %150 = vmatprep.subr.mxu0 %v22_v2  ;;  %v19_v6 = vld [vmem:[%s252_s1 + $0x10] sm:$0xff]  ;;  %v18_v7 = vld [vmem:[%s252_s1 + $0x8] sm:$0xff]  ;;  %v17_v8 = vld [vmem:[%s252_s1] sm:$0xff]  ;;  %s122_s8 = sshll.u32 %s190_s7, 4  ;;  %s123_s8 = int_to_ptr.vmem [resolvable:$true] %s122_s8 }
   0x7   :  { %151 = vmatpush3.msra.mxu0 %v22_v2  ;;  %v16_v9 = vld [vmem:[%s251_s0 + $0x8] sm:$0xff]  ;;  %v133_v10 = vld [vmem:[%s253_s2] ss:$0 sm:$0xff]  ;;  %s168_s1 = scalar_lea.vmem %s123_s8, 256  ;;  %p173_p1 = scmp.lt.s32.totalorder %s123_s8, %s123_s8 }
   0x8   :  { %152 = vmatprep.subr.mxu0 %v21_v4  ;;  %p169_p0 = scmp.ne.s32.totalorder %s123_s8, %s168_s1  ;;  %p174_p2 = scmp.lt.s32.totalorder %s168_s1, %s168_s1 }
   0x9   :  { %153 = vmatpush3.msra.mxu0 %v21_v4 }
   0xa   :  { %154 = vmatprep.subr.mxu0 %v20_v5  ;;  %p175_p3 = por %p174_p2, %p173_p1 }
   0xb   :  { %155 = vmatpush3.msra.mxu0 %v20_v5 }
   0xc   :  { %156 = vmatprep.subr.mxu0 %v19_v6  ;;  %p176_p4 = pnand %p175_p3, %p169_p0 }
   0xd   :  { %157 = vmatpush3.msra.mxu0 %v19_v6 }
   0xe   :  { %158 = vmatprep.subr.mxu0 %v18_v7 }
   0xf   :  { %159 = vmatpush3.msra.mxu0 %v18_v7 }
  0x10   :  { %160 = vmatprep.subr.mxu0 %v17_v8 }
  0x11   :  { %161 = vmatpush3.msra.mxu0 %v17_v8 }
  0x12   :  { %163 = vmatmul.mubr.msk.f32.vlgmr.msra.gmra.mxu0 %vm32_vm0, %v16_v9 }
  0xd2   :  { %v164_v11 = vpop.f32.mrf.mxu0 }
  0xd3   :  { %v111_v12 = vadd.f32 %v164_v11, %v133_v10 }
  0xd4   :  { %v105_v13 = vpop.f32.mrf.mxu0 }
  0xd5   :  { %116 = vst.msk [vmem:[#allocation2 + $0x8] sm:$0xff] %vm114_vm1, %v111_v12  ;;  %v106_v14 = vadd.f32 %v133_v10, %v105_v13 }
  0xd7   :  { %115 = vst.msk [vmem:[#allocation2] sm:$0xff] %vm114_vm1, %v106_v14 }
  0xd8   :  { %179 = shalt.err (!%p176_p4)
}
  0xd9   :  { %s191_s0 = smov 128   ;;  %s192_s9 = smov 8  }
  0xda   :  { %128 = dma.vmem_to_hbm [thread:$0]  %s123_s8, 256, %s254_s3, [#allocation3], %s191_s0, %s191_s0, %s192_s9  }
  0xdb   :  { %188 = dma.done.wait [#allocation3], 256  }
  0xdc   :  { %189 = vsyncadd [#allocation3], 4294967040 }
  0xdd   :  { %132 = vsyncpa [#allocation3], 1 }

// kernel: tpu_custom_call.1
= control target key start
LH: loop header
LB: loop body
LE: loop exit
PB: predicated region body
PF: predicated region fallthrough
CT: control target
= control target key end

     0   :  { %vm32_vm0 = vcmask 523264   ;;  %s251_s0 = inlined_call_operand.vmem [shape: f32[10,64], index: 0, kind: input, shape index: {}]   ;;  %s252_s1 = inlined_call_operand.vmem [shape: f32[64,32], index: 1, kind: input, shape index: {}]   ;;  %s253_s2 = inlined_call_operand.vmem [shape: f32[1,32], index: 2, kind: input, shape index: {}]   ;;  %s254_s3 = inlined_call_operand.hbm [shape: f32[10,32], index: 3, kind: output, shape index: {}]  }
   0x1   :  { %v24_v0 = vld [vmem:[%s252_s1 + $0x38] sm:$0xff]  ;;  %v23_v1 = vld [vmem:[%s252_s1 + $0x30] sm:$0xff]  ;;  %v22_v2 = vld [vmem:[%s252_s1 + $0x28] sm:$0xff] }
   0x2   :  { %146 = vmatprep.subr.mxu0 %v24_v0  ;;  %v15_v3 = vld [vmem:[%s251_s0] sm:$0xff] }
   0x3   :  { %147 = vmatpush3.msra.mxu0 %v24_v0  ;;  %162 = vmatprep.mubr.msk.f32.mxu0 %vm32_vm0, %v15_v3 }
   0x4   :  { %148 = vmatprep.subr.mxu0 %v23_v1 }
   0x5   :  { %8 = vsyncpa [#allocation3], 0  ;;  %149 = vmatpush3.msra.mxu0 %v23_v1  ;;  %v21_v4 = vld [vmem:[%s252_s1 + $0x20] sm:$0xff]  ;;  %v20_v5 = vld [vmem:[%s252_s1 + $0x18] sm:$0xff]  ;;  %s190_s7 = smov [#allocation2]   ;;  %vm114_vm1 = vcmask 261120  }
   0x6   :  { %150 = vmatprep.subr.mxu0 %v22_v2  ;;  %v19_v6 = vld [vmem:[%s252_s1 + $0x10] sm:$0xff]  ;;  %v18_v7 = vld [vmem:[%s252_s1 + $0x8] sm:$0xff]  ;;  %v17_v8 = vld [vmem:[%s252_s1] sm:$0xff]  ;;  %s122_s8 = sshll.u32 %s190_s7, 4  ;;  %s123_s8 = int_to_ptr.vmem [resolvable:$true] %s122_s8 }
   0x7   :  { %151 = vmatpush3.msra.mxu0 %v22_v2  ;;  %v16_v9 = vld [vmem:[%s251_s0 + $0x8] sm:$0xff]  ;;  %v133_v10 = vld [vmem:[%s253_s2] ss:$0 sm:$0xff]  ;;  %s168_s1 = scalar_lea.vmem %s123_s8, 256  ;;  %p173_p1 = scmp.lt.s32.totalorder %s123_s8, %s123_s8 }
   0x8   :  { %152 = vmatprep.subr.mxu0 %v21_v4  ;;  %p169_p0 = scmp.ne.s32.totalorder %s123_s8, %s168_s1  ;;  %p174_p2 = scmp.lt.s32.totalorder %s168_s1, %s168_s1 }
   0x9   :  { %153 = vmatpush3.msra.mxu0 %v21_v4 }
   0xa   :  { %154 = vmatprep.subr.mxu0 %v20_v5  ;;  %p175_p3 = por %p174_p2, %p173_p1 }
   0xb   :  { %155 = vmatpush3.msra.mxu0 %v20_v5 }
   0xc   :  { %156 = vmatprep.subr.mxu0 %v19_v6  ;;  %p176_p4 = pnand %p175_p3, %p169_p0 }
   0xd   :  { %157 = vmatpush3.msra.mxu0 %v19_v6 }
   0xe   :  { %158 = vmatprep.subr.mxu0 %v18_v7 }
   0xf   :  { %159 = vmatpush3.msra.mxu0 %v18_v7 }
  0x10   :  { %160 = vmatprep.subr.mxu0 %v17_v8 }
  0x11   :  { %161 = vmatpush3.msra.mxu0 %v17_v8 }
  0x12   :  { %163 = vmatmul.mubr.msk.f32.vlgmr.msra.gmra.mxu0 %vm32_vm0, %v16_v9 }
  0xd2   :  { %v164_v11 = vpop.f32.mrf.mxu0 }
  0xd3   :  { %v111_v12 = vadd.f32 %v164_v11, %v133_v10 }
  0xd4   :  { %v105_v13 = vpop.f32.mrf.mxu0 }
  0xd5   :  { %116 = vst.msk [vmem:[#allocation2 + $0x8] sm:$0xff] %vm114_vm1, %v111_v12  ;;  %v106_v14 = vadd.f32 %v133_v10, %v105_v13 }
  0xd7   :  { %115 = vst.msk [vmem:[#allocation2] sm:$0xff] %vm114_vm1, %v106_v14 }
  0xd8   :  { %179 = shalt.err (!%p176_p4)
}
  0xd9   :  { %s191_s0 = smov 128   ;;  %s192_s9 = smov 8  }
  0xda   :  { %128 = dma.vmem_to_hbm [thread:$0]  %s123_s8, 256, %s254_s3, [#allocation3], %s191_s0, %s191_s0, %s192_s9  }
  0xdb   :  { %188 = dma.done.wait [#allocation3], 256  }
  0xdc   :  { %189 = vsyncadd [#allocation3], 4294967040 }
  0xdd   :  { %132 = vsyncpa [#allocation3], 1 }

</bundles_post_ra>
